<compile_context>
chip_gen: v6e
topology: v6e:2x2x1
jax: 0.10.0
libtpu: 0.0.40
codegen_flags: <defaults>
</compile_context>

<pallas_src>
import functools

import numpy as np
import jax
import jax.numpy as jnp
from jax.experimental import pallas as pl
from jax.experimental.pallas import tpu as pltpu


# ----------------------------------------------------------------------------
# Host-side parameter construction (glue; matches LMUCell.__init__ semantics)
# ----------------------------------------------------------------------------
def _expm(M, terms=30):
    """Matrix exponential (float64) via scaling-and-squaring + Taylor series."""
    M = np.asarray(M, dtype=np.float64)
    norm = np.linalg.norm(M, 1)
    s = int(np.ceil(np.log2(norm))) + 1 if norm > 0 else 0
    s = max(s, 0)
    Ms = M / (2.0 ** s)
    n = M.shape[0]
    E = np.eye(n)
    term = np.eye(n)
    for k in range(1, terms + 1):
        term = term @ Ms / k
        E = E + term
    for _ in range(s):
        E = E @ E
    return E


def gen_AB(memory_size, theta=1.0):
    """Pade approximants of the LTI state-space matrices + ZOH discretization
    (replicates scipy cont2discrete(..., method='zoh') used by the module)."""
    Q = np.arange(memory_size, dtype=np.float64).reshape(-1, 1)
    R = (2 * Q + 1) / theta
    i, j = np.meshgrid(Q, Q, indexing="ij")
    A = np.where(i < j, -1.0, (-1.0) ** (i - j + 1)) * R          # [N, N]
    B = ((-1.0) ** Q) * R                                          # [N, 1]
    # ZOH: expm([[A, B], [0, 0]] * dt), dt = 1.0
    N = memory_size
    M = np.zeros((N + 1, N + 1), dtype=np.float64)
    M[:N, :N] = A
    M[:N, N:] = B
    EM = _expm(M * 1.0)
    Ad = EM[:N, :N]
    Bd = EM[:N, N:]
    return Ad.astype(np.float32), Bd.astype(np.float32)


def init_params(key, in_dim, hidden_size, memory_size):
    """Deterministic parameter init mirroring LMUCell._init_Parameters."""
    k_ex, k_eh, k_wx, k_wh, k_wm = jax.random.split(key, 5)
    # LeCun uniform: limit = sqrt(3 / fan_in)
    lim_ex = np.sqrt(3.0 / in_dim)
    lim_eh = np.sqrt(3.0 / hidden_size)
    e_x = jax.random.uniform(k_ex, (1, in_dim), jnp.float32, -lim_ex, lim_ex)
    e_h = jax.random.uniform(k_eh, (1, hidden_size), jnp.float32, -lim_eh, lim_eh)
    e_m = jnp.zeros((1, memory_size), jnp.float32)
    # Xavier normal: std = sqrt(2 / (fan_in + fan_out))
    W_x = jax.random.normal(k_wx, (hidden_size, in_dim), jnp.float32) * np.sqrt(
        2.0 / (in_dim + hidden_size))
    W_h = jax.random.normal(k_wh, (hidden_size, hidden_size), jnp.float32) * np.sqrt(
        2.0 / (hidden_size + hidden_size))
    W_m = jax.random.normal(k_wm, (hidden_size, memory_size), jnp.float32) * np.sqrt(
        2.0 / (hidden_size + memory_size))
    return e_x, e_h, e_m, W_x, W_h, W_m


# ----------------------------------------------------------------------------
# Hardware introspection (best effort; never fatal)
# ----------------------------------------------------------------------------
def _num_tensorcores_per_chip():
    """2 on v7x (dual TensorCore), 1 on v5e/v6e.  Best effort with fallback."""
    try:
        info = pltpu.get_tpu_info()
        for attr in ("num_cores", "core_count", "num_tensorcores",
                     "tensorcore_count", "cores_per_chip"):
            n = getattr(info, attr, None)
            if isinstance(n, int) and 1 <= n <= 8:
                return n
    except Exception:
        pass
    try:
        kind = jax.devices()[0].device_kind.lower()
        if "v7" in kind:
            return 2
    except Exception:
        pass
    return 1


def _round_up(x, m):
    return ((x + m - 1) // m) * m


# ----------------------------------------------------------------------------
# Pallas kernel: one LMU cell step for a block of batch rows.
# Six independent MXU matmuls (u fully folded into the weights host-side),
# one tanh, two lane-dense outputs.  No transposes, no slicing, no broadcasts.
# ----------------------------------------------------------------------------
def lmu_cell_kernel(x_ref, h_ref, m_ref,
                    wx_h_ref, wh_h_ref, wm_h_ref,
                    wx_m_ref, wh_m_ref, wm_m_ref,
                    h_out_ref, m_out_ref, *, matmul_dtype):
    f32 = jnp.float32
    # Cast MXU operands in-kernel (VPU); elementwise math & tanh stay f32.
    x = x_ref[...].astype(matmul_dtype)                  # [bb, in_dim]
    h = h_ref[...].astype(matmul_dtype)                  # [bb, hidden]
    m = m_ref[...].astype(matmul_dtype)                  # [bb, memory]

    # h_pre = x W_x^T + h W_h^T + m_new W_m^T   (fold already applied to weights)
    h_pre = (jnp.dot(x, wx_h_ref[...], preferred_element_type=f32)
             + jnp.dot(h, wh_h_ref[...], preferred_element_type=f32)
             + jnp.dot(m, wm_h_ref[...], preferred_element_type=f32))  # [bb, hidden]

    # m_new = m A^T + u B^T                     (fold already applied to weights)
    m_new = (jnp.dot(x, wx_m_ref[...], preferred_element_type=f32)
             + jnp.dot(h, wh_m_ref[...], preferred_element_type=f32)
             + jnp.dot(m, wm_m_ref[...], preferred_element_type=f32))  # [bb, memory]

    h_out_ref[...] = jnp.tanh(h_pre).astype(h_out_ref.dtype)
    m_out_ref[...] = m_new.astype(m_out_ref.dtype)


def lmu_cell_pallas(x, h, m, e_x, e_h, e_m, A, B, W_x, W_h, W_m,
                    *, block_b=None, matmul_dtype=jnp.bfloat16):
    batch, in_dim = x.shape
    hidden = h.shape[1]
    memory = m.shape[1]
    K = in_dim + hidden + memory

    # ---- host-side weight prep: full algebraic fold (u never appears) ----
    WmB = W_m @ B                                       # [hidden, 1]
    WmA = W_m @ A                                       # [hidden, memory]
    wx_h = W_x.T + e_x.T @ WmB.T                        # [in_dim, hidden]
    wh_h = W_h.T + e_h.T @ WmB.T                        # [hidden, hidden]
    wm_h = WmA.T + e_m.T @ WmB.T                        # [memory, hidden]
    wx_m = e_x.T @ B.T                                  # [in_dim, memory]
    wh_m = e_h.T @ B.T                                  # [hidden, memory]
    wm_m = A.T + e_m.T @ B.T                            # [memory, memory]
    weights = [w.astype(matmul_dtype)
               for w in (wx_h, wh_h, wm_h, wx_m, wh_m, wm_m)]
    # NOTE: at production hidden/memory, choose them as multiples of the MXU
    # width (256 on v6e/v7x, 128 on v5e) so no systolic-array lanes are wasted.

    # ---- generation-aware batch tiling ----
    num_tc = _num_tensorcores_per_chip()
    if block_b is None:
        if num_tc >= 2 and batch > 8:
            # >=2 grid steps so dimension_semantics=("parallel",) can shard
            # across both v7x TensorCores, robust to any batch size.
            block_b = _round_up(pl.cdiv(batch, 2), 8)
        else:
            # Single TensorCore: one big block (no per-step grid overhead),
            # capped so huge batches still fit VMEM comfortably.
            block_b = min(_round_up(batch, 8), 1024)
    block_b = min(block_b, _round_up(batch, 8))
    padded_batch = _round_up(batch, block_b)
    if padded_batch != batch:
        pad = padded_batch - batch
        x = jnp.pad(x, ((0, pad), (0, 0)))
        h = jnp.pad(h, ((0, pad), (0, 0)))
        m = jnp.pad(m, ((0, pad), (0, 0)))
    grid = (padded_batch // block_b,)
    bb = block_b

    # ---- explicit VMEM budget: weights + double-buffered activation tiles ----
    mm_itemsize = jnp.dtype(matmul_dtype).itemsize
    weight_bytes = K * (hidden + memory) * mm_itemsize
    step_bytes = bb * (K + hidden + memory) * 4          # f32 in/out tiles
    vmem_limit = int(min(max(4 * (weight_bytes + step_bytes) + (1 << 20),
                             16 << 20), 48 << 20))

    rows = lambda width: pl.BlockSpec((bb, width), lambda i: (i, 0))   # batch-tiled
    rep = lambda shape: pl.BlockSpec(shape, lambda i: (0, 0))          # resident weights
    # NOTE: the weight blocks have a constant index_map (re-fetch is skipped);
    # at production sizes verify in the MLIR that they are single-buffered.

    h_new, m_new = pl.pallas_call(
        functools.partial(lmu_cell_kernel, matmul_dtype=matmul_dtype),
        out_shape=(jax.ShapeDtypeStruct((padded_batch, hidden), jnp.float32),
                   jax.ShapeDtypeStruct((padded_batch, memory), jnp.float32)),
        grid=grid,
        in_specs=[
            rows(in_dim),                # x
            rows(hidden),                # h
            rows(memory),                # m
            rep((in_dim, hidden)),       # wx_h
            rep((hidden, hidden)),       # wh_h
            rep((memory, hidden)),       # wm_h
            rep((in_dim, memory)),       # wx_m
            rep((hidden, memory)),       # wh_m
            rep((memory, memory)),       # wm_m
        ],
        out_specs=(rows(hidden), rows(memory)),
        compiler_params=pltpu.CompilerParams(
            dimension_semantics=("parallel",),
            vmem_limit_bytes=vmem_limit),
    )(x, h, m, *weights)

    if padded_batch != batch:
        h_new = h_new[:batch]
        m_new = m_new[:batch]
    return h_new, m_new


# ----------------------------------------------------------------------------
# Pure-JAX reference (mirrors the PyTorch forward exactly for 2-D x)
# ----------------------------------------------------------------------------
def lmu_cell_ref(x, h, m, e_x, e_h, e_m, A, B, W_x, W_h, W_m):
    u = x @ e_x.T + h @ e_h.T + m @ e_m.T
    m_new = m @ A.T + u @ B.T
    h_new = jnp.tanh(x @ W_x.T + h @ W_h.T + m_new @ W_m.T)
    return h_new, m_new


if __name__ == "__main__":
    batch = 16
    in_dim = 16
    hidden_size = 32
    memory_size = 64
    theta = 1.0

    # Parameters (deterministic, in-script).
    A_np, B_np = gen_AB(memory_size, theta)
    A = jnp.asarray(A_np)              # [memory, memory]
    B = jnp.asarray(B_np)              # [memory, 1]
    key = jax.random.PRNGKey(0)
    k_param, k_x, k_h, k_m = jax.random.split(key, 4)
    e_x, e_h, e_m, W_x, W_h, W_m = init_params(k_param, in_dim, hidden_size, memory_size)

    # Inputs: x_t [B, in_dim], state (h [B, hidden], m [B, memory]).
    x = jax.random.normal(k_x, (batch, in_dim), jnp.float32)
    h0 = jax.random.normal(k_h, (batch, hidden_size), jnp.float32)
    m0 = jax.random.normal(k_m, (batch, memory_size), jnp.float32)

    h_ref, m_ref = lmu_cell_ref(x, h0, m0, e_x, e_h, e_m, A, B, W_x, W_h, W_m)
    h_ref = np.asarray(h_ref)
    m_ref = np.asarray(m_ref)

    # 1) Exact-math check: f32 MXU operands (fold only changes fp32 rounding).
    h_f32, m_f32 = lmu_cell_pallas(x, h0, m0, e_x, e_h, e_m, A, B, W_x, W_h, W_m,
                                   matmul_dtype=jnp.float32)
    jax.block_until_ready((h_f32, m_f32))
    np.testing.assert_allclose(np.asarray(h_f32), h_ref, rtol=1e-4, atol=1e-4)
    np.testing.assert_allclose(np.asarray(m_f32), m_ref, rtol=1e-4, atol=1e-4)

    # 2) Default (bf16 MXU operands, f32 accumulation): loose sanity tolerance.
    #    Note: for long recurrent rollouts keep matmul_dtype=f32 so the m-state
    #    recurrence does not accumulate bf16 quantization error.
    h_bf, m_bf = lmu_cell_pallas(x, h0, m0, e_x, e_h, e_m, A, B, W_x, W_h, W_m)
    jax.block_until_ready((h_bf, m_bf))
    np.testing.assert_allclose(np.asarray(h_bf), h_ref, rtol=2e-1,
                               atol=2e-1 * max(1.0, float(np.max(np.abs(h_ref)))))
    np.testing.assert_allclose(np.asarray(m_bf), m_ref, rtol=2e-1,
                               atol=2e-1 * max(1.0, float(np.max(np.abs(m_ref)))))

    print("KERNEL_OK")
</pallas_src>

<mosaic_0001>
module attributes {stable_mosaic.version = 11 : i64} {
  func.func @lmu_cell_kernel(%arg0: i32, %arg1: memref<16x16xf32, #tpu.memory_space<vmem>>, %arg2: memref<16x32xf32, #tpu.memory_space<vmem>>, %arg3: memref<16x64xf32, #tpu.memory_space<vmem>>, %arg4: memref<16x32xf32, #tpu.memory_space<vmem>>, %arg5: memref<32x32xf32, #tpu.memory_space<vmem>>, %arg6: memref<64x32xf32, #tpu.memory_space<vmem>>, %arg7: memref<16x64xf32, #tpu.memory_space<vmem>>, %arg8: memref<32x64xf32, #tpu.memory_space<vmem>>, %arg9: memref<64x64xf32, #tpu.memory_space<vmem>>, %arg10: memref<16x32xf32, #tpu.memory_space<vmem>>, %arg11: memref<16x64xf32, #tpu.memory_space<vmem>>) attributes {dimension_semantics = [#tpu.dimension_semantics<parallel>], iteration_bounds = array<i64: 1>, scalar_prefetch = 0 : i64, scratch_operands = 0 : i64, tpu.core_type = #tpu.core_type<tc>, window_params = [{transform_indices = @transform_0, window_bounds = array<i64: 16, 16>}, {transform_indices = @transform_1, window_bounds = array<i64: 16, 32>}, {transform_indices = @transform_2, window_bounds = array<i64: 16, 64>}, {pipeline_mode = #tpu.pipeline_mode<synchronous>, transform_indices = @transform_3, window_bounds = array<i64: 16, 32>}, {pipeline_mode = #tpu.pipeline_mode<synchronous>, transform_indices = @transform_4, window_bounds = array<i64: 32, 32>}, {pipeline_mode = #tpu.pipeline_mode<synchronous>, transform_indices = @transform_5, window_bounds = array<i64: 64, 32>}, {pipeline_mode = #tpu.pipeline_mode<synchronous>, transform_indices = @transform_6, window_bounds = array<i64: 16, 64>}, {pipeline_mode = #tpu.pipeline_mode<synchronous>, transform_indices = @transform_7, window_bounds = array<i64: 32, 64>}, {pipeline_mode = #tpu.pipeline_mode<synchronous>, transform_indices = @transform_8, window_bounds = array<i64: 64, 64>}, {transform_indices = @transform_9, window_bounds = array<i64: 16, 32>}, {transform_indices = @transform_10, window_bounds = array<i64: 16, 64>}]} {
    %c0 = arith.constant 0 : index
    %c0_0 = arith.constant 0 : index
    %0 = vector.load %arg1[%c0, %c0_0] : memref<16x16xf32, #tpu.memory_space<vmem>>, vector<16x16xf32>
    %c0_1 = arith.constant 0 : index
    %c0_2 = arith.constant 0 : index
    %1 = vector.load %arg2[%c0_1, %c0_2] : memref<16x32xf32, #tpu.memory_space<vmem>>, vector<16x32xf32>
    %c0_3 = arith.constant 0 : index
    %c0_4 = arith.constant 0 : index
    %2 = vector.load %arg3[%c0_3, %c0_4] : memref<16x64xf32, #tpu.memory_space<vmem>>, vector<16x64xf32>
    %c0_5 = arith.constant 0 : index
    %c0_6 = arith.constant 0 : index
    %3 = vector.load %arg4[%c0_5, %c0_6] : memref<16x32xf32, #tpu.memory_space<vmem>>, vector<16x32xf32>
    %cst = arith.constant dense<0.000000e+00> : vector<16x32xf32>
    %4 = tpu.matmul %0, %3, %cst {dimension_numbers = #tpu.dot_dimension_numbers<[1], [0], [0], [1], [0, 0, 1, 1], [], []>} : vector<16x16xf32>, vector<16x32xf32>, vector<16x32xf32> -> vector<16x32xf32>
    %c0_7 = arith.constant 0 : index
    %c0_8 = arith.constant 0 : index
    %5 = vector.load %arg5[%c0_7, %c0_8] : memref<32x32xf32, #tpu.memory_space<vmem>>, vector<32x32xf32>
    %cst_9 = arith.constant dense<0.000000e+00> : vector<16x32xf32>
    %6 = tpu.matmul %1, %5, %cst_9 {dimension_numbers = #tpu.dot_dimension_numbers<[1], [0], [0], [1], [0, 0, 1, 1], [], []>} : vector<16x32xf32>, vector<32x32xf32>, vector<16x32xf32> -> vector<16x32xf32>
    %7 = arith.addf %4, %6 : vector<16x32xf32>
    %c0_10 = arith.constant 0 : index
    %c0_11 = arith.constant 0 : index
    %8 = vector.load %arg6[%c0_10, %c0_11] : memref<64x32xf32, #tpu.memory_space<vmem>>, vector<64x32xf32>
    %cst_12 = arith.constant dense<0.000000e+00> : vector<16x32xf32>
    %9 = tpu.matmul %2, %8, %cst_12 {dimension_numbers = #tpu.dot_dimension_numbers<[1], [0], [0], [1], [0, 0, 1, 1], [], []>} : vector<16x64xf32>, vector<64x32xf32>, vector<16x32xf32> -> vector<16x32xf32>
    %10 = arith.addf %7, %9 : vector<16x32xf32>
    %c0_13 = arith.constant 0 : index
    %c0_14 = arith.constant 0 : index
    %11 = vector.load %arg7[%c0_13, %c0_14] : memref<16x64xf32, #tpu.memory_space<vmem>>, vector<16x64xf32>
    %cst_15 = arith.constant dense<0.000000e+00> : vector<16x64xf32>
    %12 = tpu.matmul %0, %11, %cst_15 {dimension_numbers = #tpu.dot_dimension_numbers<[1], [0], [0], [1], [0, 0, 1, 1], [], []>} : vector<16x16xf32>, vector<16x64xf32>, vector<16x64xf32> -> vector<16x64xf32>
    %c0_16 = arith.constant 0 : index
    %c0_17 = arith.constant 0 : index
    %13 = vector.load %arg8[%c0_16, %c0_17] : memref<32x64xf32, #tpu.memory_space<vmem>>, vector<32x64xf32>
    %cst_18 = arith.constant dense<0.000000e+00> : vector<16x64xf32>
    %14 = tpu.matmul %1, %13, %cst_18 {dimension_numbers = #tpu.dot_dimension_numbers<[1], [0], [0], [1], [0, 0, 1, 1], [], []>} : vector<16x32xf32>, vector<32x64xf32>, vector<16x64xf32> -> vector<16x64xf32>
    %15 = arith.addf %12, %14 : vector<16x64xf32>
    %c0_19 = arith.constant 0 : index
    %c0_20 = arith.constant 0 : index
    %16 = vector.load %arg9[%c0_19, %c0_20] : memref<64x64xf32, #tpu.memory_space<vmem>>, vector<64x64xf32>
    %cst_21 = arith.constant dense<0.000000e+00> : vector<16x64xf32>
    %17 = tpu.matmul %2, %16, %cst_21 {dimension_numbers = #tpu.dot_dimension_numbers<[1], [0], [0], [1], [0, 0, 1, 1], [], []>} : vector<16x64xf32>, vector<64x64xf32>, vector<16x64xf32> -> vector<16x64xf32>
    %18 = arith.addf %15, %17 : vector<16x64xf32>
    %19 = math.tanh %10 : vector<16x32xf32>
    %c0_22 = arith.constant 0 : index
    %c0_23 = arith.constant 0 : index
    %20 = vector.load %arg10[%c0_22, %c0_23] : memref<16x32xf32, #tpu.memory_space<vmem>>, vector<16x32xf32>
    tpu.vector_store %arg10[%c0_22, %c0_23], %19 {strides = array<i32>} : memref<16x32xf32, #tpu.memory_space<vmem>>, vector<16x32xf32>,
    %c0_24 = arith.constant 0 : index
    %c0_25 = arith.constant 0 : index
    %21 = vector.load %arg11[%c0_24, %c0_25] : memref<16x64xf32, #tpu.memory_space<vmem>>, vector<16x64xf32>
    tpu.vector_store %arg11[%c0_24, %c0_25], %18 {strides = array<i32>} : memref<16x64xf32, #tpu.memory_space<vmem>>, vector<16x64xf32>,
    return
  }
  func.func @transform_0(%arg0: i32) -> (i32, i32) {
    %c0_i32 = arith.constant 0 : i32
    %c0_i32_0 = arith.constant 0 : i32
    return %arg0, %c0_i32 : i32, i32
  }
  func.func @transform_1(%arg0: i32) -> (i32, i32) {
    %c0_i32 = arith.constant 0 : i32
    %c0_i32_0 = arith.constant 0 : i32
    return %arg0, %c0_i32 : i32, i32
  }
  func.func @transform_2(%arg0: i32) -> (i32, i32) {
    %c0_i32 = arith.constant 0 : i32
    %c0_i32_0 = arith.constant 0 : i32
    return %arg0, %c0_i32 : i32, i32
  }
  func.func @transform_3(%arg0: i32) -> (i32, i32) {
    %c0_i32 = arith.constant 0 : i32
    %c0_i32_0 = arith.constant 0 : i32
    %c0_i32_1 = arith.constant 0 : i32
    return %c0_i32, %c0_i32_0 : i32, i32
  }
  func.func @transform_4(%arg0: i32) -> (i32, i32) {
    %c0_i32 = arith.constant 0 : i32
    %c0_i32_0 = arith.constant 0 : i32
    %c0_i32_1 = arith.constant 0 : i32
    return %c0_i32, %c0_i32_0 : i32, i32
  }
  func.func @transform_5(%arg0: i32) -> (i32, i32) {
    %c0_i32 = arith.constant 0 : i32
    %c0_i32_0 = arith.constant 0 : i32
    %c0_i32_1 = arith.constant 0 : i32
    return %c0_i32, %c0_i32_0 : i32, i32
  }
  func.func @transform_6(%arg0: i32) -> (i32, i32) {
    %c0_i32 = arith.constant 0 : i32
    %c0_i32_0 = arith.constant 0 : i32
    %c0_i32_1 = arith.constant 0 : i32
    return %c0_i32, %c0_i32_0 : i32, i32
  }
  func.func @transform_7(%arg0: i32) -> (i32, i32) {
    %c0_i32 = arith.constant 0 : i32
    %c0_i32_0 = arith.constant 0 : i32
    %c0_i32_1 = arith.constant 0 : i32
    return %c0_i32, %c0_i32_0 : i32, i32
  }
  func.func @transform_8(%arg0: i32) -> (i32, i32) {
    %c0_i32 = arith.constant 0 : i32
    %c0_i32_0 = arith.constant 0 : i32
    %c0_i32_1 = arith.constant 0 : i32
    return %c0_i32, %c0_i32_0 : i32, i32
  }
  func.func @transform_9(%arg0: i32) -> (i32, i32) {
    %c0_i32 = arith.constant 0 : i32
    %c0_i32_0 = arith.constant 0 : i32
    return %arg0, %c0_i32 : i32, i32
  }
  func.func @transform_10(%arg0: i32) -> (i32, i32) {
    %c0_i32 = arith.constant 0 : i32
    %c0_i32_0 = arith.constant 0 : i32
    return %arg0, %c0_i32 : i32, i32
  }
}

</mosaic_0001>

<bundles_post_ra>
// kernel: tpu_custom_call.1
= control target key start
LH: loop header
LB: loop body
LE: loop exit
PB: predicated region body
PF: predicated region fallthrough
CT: control target
= control target key end

     0   :  { %16 = vsyncpa [#allocation3], 0  ;;  %s1170_s0 = inlined_call_operand.hbm [shape: f32[16,16], index: 0, kind: input, shape index: {}]   ;;  %s1171_s1 = inlined_call_operand.hbm [shape: f32[16,32], index: 1, kind: input, shape index: {}]   ;;  %s1172_s2 = inlined_call_operand.hbm [shape: f32[16,64], index: 2, kind: input, shape index: {}]   ;;  %s1173_s3 = inlined_call_operand.hbm [shape: f32[16,32], index: 3, kind: input, shape index: {}]   ;;  %s1174_s4 = inlined_call_operand.vmem [shape: f32[32,32], index: 4, kind: input, shape index: {}]   ;;  %s1175_s5 = inlined_call_operand.vmem [shape: f32[64,32], index: 5, kind: input, shape index: {}]   ;;  %s1176_s6 = inlined_call_operand.hbm [shape: f32[16,64], index: 6, kind: input, shape index: {}]   ;;  %s1177_s7 = inlined_call_operand.hbm [shape: f32[32,64], index: 7, kind: input, shape index: {}]   ;;  %s1178_s8 = inlined_call_operand.vmem [shape: f32[64,64], index: 8, kind: input, shape index: {}]   ;;  %s1179_s9 = inlined_call_operand.hbm [shape: f32[16,32], index: 9, kind: output, shape index: {0}]   ;;  %s1180_s10 = inlined_call_operand.hbm [shape: f32[16,64], index: 10, kind: output, shape index: {1}]  }
   0x1   :  { %17 = vsyncpa [#allocation6], 0 }
   0x2   :  { %18 = vsyncpa [#allocation9], 0 }
   0x3   :  { %19 = vsyncpa [#allocation12], 0 }
   0x4   :  { %20 = vsyncpa [#allocation4], 0 }
   0x5   :  { %21 = vsyncpa [#allocation15], 0  ;;  %s981_s13 = smov [#allocation5]   ;;  %s982_s15 = smov [#allocation8]  }
   0x6   :  { %s39_s14 = sshll.u32 %s981_s13, 4  ;;  %s63_s16 = sshll.u32 %s982_s15, 4  ;;  %s40_s14 = int_to_ptr.vmem [resolvable:$true] %s39_s14  ;;  %s64_s16 = int_to_ptr.vmem [resolvable:$true] %s63_s16 }
   0x7   :  { %s817_s17 = scalar_lea.vmem %s40_s14, 256  ;;  %p822_p1 = scmp.lt.s32.totalorder %s40_s14, %s40_s14 }
   0x8   :  { %p818_p0 = scmp.ne.s32.totalorder %s40_s14, %s817_s17  ;;  %p823_p2 = scmp.lt.s32.totalorder %s817_s17, %s817_s17 }
   0xa   :  { %p824_p3 = por %p823_p2, %p822_p1 }
   0xc   :  { %p825_p4 = pnand %p824_p3, %p818_p0 }
   0xe   :  { %828 = shalt.err (!%p825_p4)
}
   0xf   :  { %s983_s18 = smov 128   ;;  %s984_s19 = smov 8  }
  0x10   :  { %45 = dma.hbm_to_vmem [thread:$0]  %s1171_s1, 256, %s40_s14, [#allocation6], %s983_s18, %s983_s18, %s984_s19  }
  0x11   :  { %s837_s22 = scalar_lea.vmem %s64_s16, 256  ;;  %p842_p6 = scmp.lt.s32.totalorder %s64_s16, %s64_s16 }
  0x12   :  { %p838_p5 = scmp.ne.s32.totalorder %s64_s16, %s837_s22  ;;  %p843_p7 = scmp.lt.s32.totalorder %s837_s22, %s837_s22 }
  0x14   :  { %p844_p8 = por %p843_p7, %p842_p6 }
  0x16   :  { %p845_p9 = pnand %p844_p8, %p838_p5 }
  0x18   :  { %848 = shalt.err (!%p845_p9)
}
  0x19   :  { %69 = dma.hbm_to_vmem [thread:$0]  %s1173_s3, 256, %s64_s16, [#allocation9], %s983_s18, %s983_s18, %s984_s19  }
  0x1a   :  { %s985_s25 = smov [#allocation2]   ;;  %s986_s27 = smov [#allocation7]  }
  0x1b   :  { %s27_s26 = sshll.u32 %s985_s25, 4  ;;  %s51_s28 = sshll.u32 %s986_s27, 4  ;;  %s28_s26 = int_to_ptr.vmem [resolvable:$true] %s27_s26  ;;  %s52_s28 = int_to_ptr.vmem [resolvable:$true] %s51_s28 }
  0x1c   :  { %s857_s1 = scalar_lea.vmem %s28_s26, 256  ;;  %p862_p11 = scmp.lt.s32.totalorder %s28_s26, %s28_s26 }
  0x1d   :  { %p858_p10 = scmp.ne.s32.totalorder %s28_s26, %s857_s1  ;;  %p863_p12 = scmp.lt.s32.totalorder %s857_s1, %s857_s1 }
  0x1f   :  { %p864_p13 = por %p863_p12, %p862_p11 }
  0x21   :  { %p865_p0 = pnand %p864_p13, %p858_p10 }
  0x23   :  { %868 = shalt.err (!%p865_p0)
}
  0x24   :  { %33 = dma.hbm_to_vmem [thread:$0]  %s1170_s0, 256, %s28_s26, [#allocation3], %s983_s18, %s983_s18, %s984_s19  }
  0x25   :  { %s877_s3 = scalar_lea.vmem %s52_s28, 256  ;;  %p882_p2 = scmp.lt.s32.totalorder %s52_s28, %s52_s28 }
  0x26   :  { %p878_p1 = scmp.ne.s32.totalorder %s52_s28, %s877_s3  ;;  %p883_p3 = scmp.lt.s32.totalorder %s877_s3, %s877_s3 }
  0x28   :  { %p884_p4 = por %p883_p3, %p882_p2 }
  0x2a   :  { %p885_p5 = pnand %p884_p4, %p878_p1 }
  0x2c   :  { %888 = shalt.err (!%p885_p5)
}
  0x2d   :  { %57 = dma.hbm_to_vmem [thread:$0]  %s1172_s2, 256, %s52_s28, [#allocation6], %s983_s18, %s983_s18, %s984_s19  }
  0x2e   :  { %s987_s13 = smov [#allocation10]   ;;  %s988_s15 = smov [#allocation11]  }
  0x2f   :  { %s79_s14 = sshll.u32 %s987_s13, 4  ;;  %s91_s16 = sshll.u32 %s988_s15, 4  ;;  %s80_s14 = int_to_ptr.vmem [resolvable:$true] %s79_s14  ;;  %s92_s16 = int_to_ptr.vmem [resolvable:$true] %s91_s16 }
  0x30   :  { %s897_s0 = scalar_lea.vmem %s80_s14, 256  ;;  %p902_p7 = scmp.lt.s32.totalorder %s80_s14, %s80_s14 }
  0x31   :  { %p898_p6 = scmp.ne.s32.totalorder %s80_s14, %s897_s0  ;;  %p903_p8 = scmp.lt.s32.totalorder %s897_s0, %s897_s0 }
  0x33   :  { %p904_p9 = por %p903_p8, %p902_p7 }
  0x35   :  { %p905_p10 = pnand %p904_p9, %p898_p6 }
  0x37   :  { %908 = shalt.err (!%p905_p10)
}
  0x38   :  { %85 = dma.hbm_to_vmem [thread:$0]  %s1176_s6, 256, %s80_s14, [#allocation9], %s983_s18, %s983_s18, %s984_s19  }
  0x39   :  { %s917_s2 = scalar_lea.vmem %s92_s16, 512  ;;  %p922_p12 = scmp.lt.s32.totalorder %s92_s16, %s92_s16 }
  0x3a   :  { %p918_p11 = scmp.ne.s32.totalorder %s92_s16, %s917_s2  ;;  %p923_p13 = scmp.lt.s32.totalorder %s917_s2, %s917_s2 }
  0x3c   :  { %p924_p0 = por %p923_p13, %p922_p12 }
  0x3e   :  { %p925_p1 = pnand %p924_p0, %p918_p11 }
  0x40   :  { %928 = shalt.err (!%p925_p1)
}
  0x41   :  { %97 = dma.hbm_to_vmem [thread:$0]  %s1177_s7, 512, %s92_s16, [#allocation12], %s983_s18, %s983_s18, %s984_s19  }
  0x42   :  { %969 = dma.done.wait [#allocation3], 256  }
  0x43   :  { %970 = vsyncadd [#allocation3], 4294967040 }
  0x44   :  { %971 = dma.done.wait [#allocation6], 512  }
  0x45   :  { %972 = vsyncadd [#allocation6], 4294966784 }
  0x46   :  { %973 = dma.done.wait [#allocation9], 512  }
  0x47   :  { %974 = vsyncadd [#allocation9], 4294966784 }
  0x48   :  { %975 = dma.done.wait [#allocation12], 512  }
  0x49   :  { %976 = vsyncadd [#allocation12], 4294966784  ;;  %v129_v0 = vld [vmem:[%s1174_s4 + $0x18] sm:$0xff]  ;;  %v391_v1 = vld [vmem:[#allocation11 + $0x18] sm:$0xff]  ;;  %vm130_vm0 = vcmask 261120   ;;  %vm212_vm1 = vcmask 130048  }
  0x4a   :  { %v128_v2 = vld [vmem:[%s1174_s4 + $0x10] sm:$0xff]  ;;  %721 = vmatprep.subr.mxu1 %v129_v0  ;;  %758 = vmatprep.subr.mxu0 %v391_v1  ;;  %v390_v3 = vld [vmem:[#allocation11 + $0x10] sm:$0xff]  ;;  %v127_v4 = vld [vmem:[%s1174_s4 + $0x8] sm:$0xff]  ;;  %vm302_vm2 = vcmask 523264  }
  0x4b   :  { %722 = vmatpush3.msra.mxu1 %v129_v0  ;;  %759 = vmatpush3.msra.mxu0 %v391_v1  ;;  %v389_v5 = vld [vmem:[#allocation11 + $0x8] sm:$0xff]  ;;  %v126_v6 = vld [vmem:[%s1174_s4] sm:$0xff]  ;;  %v388_v7 = vld [vmem:[#allocation11] sm:$0xff] }
  0x4c   :  { %723 = vmatprep.subr.mxu1 %v128_v2  ;;  %760 = vmatprep.subr.mxu0 %v390_v3  ;;  %v120_v8 = vld [vmem:[#allocation5] sm:$0xff]  ;;  %v121_v9 = vld [vmem:[#allocation5 + $0x8] sm:$0xff]  ;;  %v387_v11 = vld [vmem:[#allocation10 + $0x8] sm:$0xff] }
  0x4d   :  { %724 = vmatpush3.msra.mxu1 %v128_v2  ;;  %761 = vmatpush3.msra.mxu0 %v390_v3  ;;  %v125_v10 = vld [vmem:[#allocation8 + $0x8] sm:$0xff]  ;;  %v124_v12 = vld [vmem:[#allocation8] sm:$0xff]  ;;  %v386_v13 = vld [vmem:[#allocation10] sm:$0xff] }
  0x4e   :  { %725 = vmatprep.subr.mxu1 %v127_v4  ;;  %762 = vmatprep.subr.mxu0 %v389_v5  ;;  %v118_v14 = vld [vmem:[#allocation2] sm:$0xff]  ;;  %v119_v15 = vld [vmem:[#allocation2 + $0x8] sm:$0xff]  ;;  %v301_v16 = vld [vmem:[%s1175_s5 + $0x38] sm:$0xff] }
  0x4f   :  { %726 = vmatpush3.msra.mxu1 %v127_v4  ;;  %763 = vmatpush3.msra.mxu0 %v389_v5  ;;  %v549_v17 = vld [vmem:[%s1178_s8 + $0x38] sm:$0xff]  ;;  %v300_v18 = vld [vmem:[%s1175_s5 + $0x30] sm:$0xff]  ;;  %v299_v20 = vld [vmem:[%s1175_s5 + $0x28] sm:$0xff] }
  0x50   :  { %727 = vmatprep.subr.mxu1 %v126_v6  ;;  %764 = vmatprep.subr.mxu0 %v388_v7  ;;  %v548_v19 = vld [vmem:[%s1178_s8 + $0x30] sm:$0xff]  ;;  %v547_v21 = vld [vmem:[%s1178_s8 + $0x28] sm:$0xff]  ;;  %v298_v22 = vld [vmem:[%s1175_s5 + $0x20] sm:$0xff] }
  0x51   :  { %728 = vmatpush3.msra.mxu1 %v126_v6  ;;  %729 = vmatprep.mubr.msk.f32.mxu1 %vm130_vm0, %v120_v8  ;;  %v546_v23 = vld [vmem:[%s1178_s8 + $0x20] sm:$0xff]  ;;  %v297_v24 = vld [vmem:[%s1175_s5 + $0x18] sm:$0xff]  ;;  %v296_v26 = vld [vmem:[%s1175_s5 + $0x10] sm:$0xff] }
  0x52   :  { %765 = vmatpush3.msra.mxu0 %v388_v7  ;;  %730 = vmatmul.mubr.msk.f32.vlgmr.msra.gmra.mxu1 %vm130_vm0, %v121_v9  ;;  %v545_v25 = vld [vmem:[%s1178_s8 + $0x18] sm:$0xff]  ;;  %v544_v27 = vld [vmem:[%s1178_s8 + $0x10] sm:$0xff]  ;;  %v295_v28 = vld [vmem:[%s1175_s5 + $0x8] sm:$0xff] }
  0x53   :  { %732 = vmatprep.subr.mxu1 %v125_v10  ;;  %766 = vmatprep.mubr.msk.f32.mxu0 %vm130_vm0, %v120_v8  ;;  %v543_v29 = vld [vmem:[%s1178_s8 + $0x8] sm:$0xff]  ;;  %v294_v30 = vld [vmem:[%s1175_s5] sm:$0xff]  ;;  %s989_s5 = smov [#allocation14]  }
  0x54   :  { %769 = vmatprep.subr.mxu0 %v387_v11  ;;  %733 = vmatpush3.msra.mxu1 %v125_v10  ;;  %v542_v31 = vld [vmem:[%s1178_s8] sm:$0xff]  ;;  %v123_v33 = vld [vmem:[#allocation7 + $0x8] sm:$0xff]  ;;  %s650_s8 = sshll.u32 %s989_s5, 4  ;;  %s651_s8 = int_to_ptr.vmem [resolvable:$true] %s650_s8 }
  0x55   :  { %767 = vmatmul.mubr.msk.f32.vlgmr.msra.gmra.mxu0 %vm130_vm0, %v121_v9  ;;  %734 = vmatprep.subr.mxu1 %v124_v12  ;;  %v122_v32 = vld [vmem:[#allocation7] sm:$0xff]  ;;  %s929_s13 = scalar_lea.vmem %s651_s8, 256  ;;  %p934_p3 = scmp.lt.s32.totalorder %s651_s8, %s651_s8 }
  0x56   :  { %770 = vmatpush3.msra.mxu0 %v387_v11  ;;  %735 = vmatpush3.msra.mxu1 %v124_v12  ;;  %p930_p2 = scmp.ne.s32.totalorder %s651_s8, %s929_s13  ;;  %p935_p4 = scmp.lt.s32.totalorder %s929_s13, %s929_s13 }
  0x57   :  { %771 = vmatprep.subr.mxu0 %v386_v13  ;;  %736 = vmatprep.mubr.msk.f32.mxu1 %vm212_vm1, %v118_v14 }
  0x58   :  { %772 = vmatpush3.msra.mxu0 %v386_v13  ;;  %737 = vmatmul.mubr.msk.f32.vlgmr.msra.gmra.mxu1 %vm212_vm1, %v119_v15  ;;  %p936_p5 = por %p935_p4, %p934_p3 }
  0x59   :  { %739 = vmatprep.subr.mxu1 %v301_v16  ;;  %773 = vmatprep.mubr.msk.f32.mxu0 %vm212_vm1, %v118_v14 }
  0x5a   :  { %776 = vmatprep.subr.mxu0 %v549_v17  ;;  %740 = vmatpush3.msra.mxu1 %v301_v16  ;;  %p937_p6 = pnand %p936_p5, %p930_p2 }
  0x5b   :  { %774 = vmatmul.mubr.msk.f32.vlgmr.msra.gmra.mxu0 %vm212_vm1, %v119_v15  ;;  %741 = vmatprep.subr.mxu1 %v300_v18 }
  0x5c   :  { %777 = vmatpush3.msra.mxu0 %v549_v17  ;;  %742 = vmatpush3.msra.mxu1 %v300_v18 }
  0x5d   :  { %778 = vmatprep.subr.mxu0 %v548_v19  ;;  %743 = vmatprep.subr.mxu1 %v299_v20 }
  0x5e   :  { %779 = vmatpush3.msra.mxu0 %v548_v19  ;;  %744 = vmatpush3.msra.mxu1 %v299_v20 }
  0x5f   :  { %780 = vmatprep.subr.mxu0 %v547_v21  ;;  %745 = vmatprep.subr.mxu1 %v298_v22 }
  0x60   :  { %781 = vmatpush3.msra.mxu0 %v547_v21  ;;  %746 = vmatpush3.msra.mxu1 %v298_v22 }
  0x61   :  { %782 = vmatprep.subr.mxu0 %v546_v23  ;;  %747 = vmatprep.subr.mxu1 %v297_v24 }
  0x62   :  { %783 = vmatpush3.msra.mxu0 %v546_v23  ;;  %748 = vmatpush3.msra.mxu1 %v297_v24 }
  0x63   :  { %784 = vmatprep.subr.mxu0 %v545_v25  ;;  %749 = vmatprep.subr.mxu1 %v296_v26 }
  0x64   :  { %785 = vmatpush3.msra.mxu0 %v545_v25  ;;  %750 = vmatpush3.msra.mxu1 %v296_v26 }
  0x65   :  { %786 = vmatprep.subr.mxu0 %v544_v27  ;;  %751 = vmatprep.subr.mxu1 %v295_v28 }
  0x66   :  { %787 = vmatpush3.msra.mxu0 %v544_v27  ;;  %752 = vmatpush3.msra.mxu1 %v295_v28 }
  0x67   :  { %788 = vmatprep.subr.mxu0 %v543_v29  ;;  %753 = vmatprep.subr.mxu1 %v294_v30 }
  0x68   :  { %789 = vmatpush3.msra.mxu0 %v543_v29  ;;  %754 = vmatpush3.msra.mxu1 %v294_v30 }
  0x69   :  { %790 = vmatprep.subr.mxu0 %v542_v31  ;;  %755 = vmatprep.mubr.msk.f32.mxu1 %vm302_vm2, %v122_v32 }
  0x6a   :  { %791 = vmatpush3.msra.mxu0 %v542_v31  ;;  %792 = vmatprep.mubr.msk.f32.mxu0 %vm302_vm2, %v122_v32 }
  0x6b   :  { %756 = vmatmul.mubr.msk.f32.vlgmr.msra.gmra.mxu1 %vm302_vm2, %v123_v33  ;;  %793 = vmatmul.mubr.msk.f32.vlgmr.msra.gmra.mxu0 %vm302_vm2, %v123_v33 }
 0x112   :  { %v731_v34 = vpop.f32.mrf.mxu1 }
 0x114   :  { %v203_v36 = vpop.f32.mrf.mxu1 }
 0x115   :  { %v768_v35 = vpop.f32.mrf.mxu0 }
 0x117   :  { %v458_v37 = vpop.f32.mrf.mxu0 }
 0x118   :  { %v738_v38 = vpop.f32.mrf.mxu1 }
 0x119   :  { %v291_v42 = vadd.f32 %v738_v38, %v731_v34 }
 0x11a   :  { %v285_v40 = vpop.f32.mrf.mxu1 }
 0x11b   :  { %v775_v39 = vpop.f32.mrf.mxu0  ;;  %v286_v46 = vadd.f32 %v285_v40, %v203_v36 }
 0x11c   :  { %v539_v43 = vadd.f32 %v775_v39, %v768_v35 }
 0x11d   :  { %v533_v41 = vpop.f32.mrf.mxu0 }
 0x11e   :  { %v534_v47 = vadd.f32 %v533_v41, %v458_v37 }
 0x12b   :  { %v757_v44 = vpop.f32.mrf.mxu1  ;;  %v794_v45 = vpop.f32.mrf.mxu0 }
 0x12c   :  { %v385_v48 = vadd.f32 %v757_v44, %v291_v42  ;;  %v626_v49 = vadd.f32 %v794_v45, %v539_v43 }
 0x12d   :  { %v375_v50 = vpop.f32.mrf.mxu1  ;;  %v616_v51 = vpop.f32.mrf.mxu0 }
 0x12e   :  { %805 = vtanh.f32 %v385_v48  ;;  %632 = vst.msk [vmem:[#allocation14 + $0x8] sm:$0xff] %vm302_vm2, %v626_v49  ;;  %v384_v52 = vadd.f32 %v375_v50, %v286_v46  ;;  %v625_v53 = vadd.f32 %v616_v51, %v534_v47 }
 0x130   :  { %807 = vtanh.f32 %v384_v52  ;;  %631 = vst.msk [vmem:[#allocation14] sm:$0xff] %vm302_vm2, %v625_v53 }
 0x131   :  { %940 = shalt.err (!%p937_p6)
}
 0x132   :  { %656 = dma.vmem_to_hbm [thread:$0]  %s651_s8, 256, %s1180_s10, [#allocation15], %s983_s18, %s983_s18, %s984_s19  }
 0x133   :  { %s990_s16 = smov [#allocation13]  }
 0x134   :  { %s638_s0 = sshll.u32 %s990_s16, 4  ;;  %s639_s0 = int_to_ptr.vmem [resolvable:$true] %s638_s0 }
 0x135   :  { %s949_s17 = scalar_lea.vmem %s639_s0, 256  ;;  %p954_p8 = scmp.lt.s32.totalorder %s639_s0, %s639_s0 }
 0x136   :  { %p950_p7 = scmp.ne.s32.totalorder %s639_s0, %s949_s17  ;;  %p955_p9 = scmp.lt.s32.totalorder %s949_s17, %s949_s17 }
 0x138   :  { %p956_p10 = por %p955_p9, %p954_p8 }
 0x13a   :  { %p957_p11 = pnand %p956_p10, %p950_p7 }
 0x13b   :  { %v806_v54 = vpop.eup %805 }
 0x13c   :  { %630 = vst.msk [vmem:[#allocation13 + $0x8] sm:$0xff] %vm130_vm0, %v806_v54 }
 0x13d   :  { %v808_v55 = vpop.eup %807 }
 0x13e   :  { %629 = vst.msk [vmem:[#allocation13] sm:$0xff] %vm130_vm0, %v808_v55 }
 0x13f   :  { %960 = shalt.err (!%p957_p11)
}
 0x140   :  { %644 = dma.vmem_to_hbm [thread:$0]  %s639_s0, 256, %s1179_s9, [#allocation4], %s983_s18, %s983_s18, %s984_s19  }
 0x141   :  { %977 = dma.done.wait [#allocation4], 256  }
 0x142   :  { %978 = vsyncadd [#allocation4], 4294967040 }
 0x143   :  { %979 = dma.done.wait [#allocation15], 256  }
 0x144   :  { %980 = vsyncadd [#allocation15], 4294967040 }
 0x145   :  { %663 = vsyncpa [#allocation3], 1 }
 0x146   :  { %664 = vsyncpa [#allocation6], 1 }
 0x147   :  { %665 = vsyncpa [#allocation9], 1 }
 0x148   :  { %666 = vsyncpa [#allocation12], 1 }
 0x149   :  { %667 = vsyncpa [#allocation4], 1 }
 0x14a   :  { %668 = vsyncpa [#allocation15], 1 }

</bundles_post_ra>
